<compile_context>
chip_gen: v7x
topology: tpu7x:2x2x1
jax: 0.10.0
libtpu: 0.0.40
codegen_flags: <defaults>
</compile_context>

<pallas_src>
import functools

import jax
import jax.numpy as jnp
from jax import lax
from jax.experimental import pallas as pl
from jax.experimental.pallas import tpu as pltpu

ALPHA = 0.25
GAMMA = 2.0   # gamma == 2 is hard-coded below as a squared focal weight


def _focal_loss_kernel(cls_ref, reg_ref, anc_ref, ann_ref, clsoh_ref, gtc_ref,
                       out_ref):
    # cls_ref : (1, K, TA)   class probabilities (anchor axis lane-dense)
    # reg_ref : (1, 4, TA)   predicted deltas
    # anc_ref : (10, TA)     [x1,y1,x2,y2,area,cx,cy,1/w,1/h,valid]
    # ann_ref : (1, M, 5)    GT [x1,y1,x2,y2,area]  (GT boxes along sublanes)
    # clsoh_ref:(1, K, M)    per-GT class one-hot   (MXU gather LHS)
    # gtc_ref : (1, 4, M)    GT box coords          (MXU gather LHS)
    # out_ref : (1, 8, 128)  rows 0/1/2 = [cls_sum, reg_sum, num_pos]
    cls_p = cls_ref[0]                         # (K, TA)
    reg_p = reg_ref[0]                         # (4, TA)
    anc = anc_ref[...]                         # (10, TA)
    ann = ann_ref[0]                           # (M, 5)
    cls_oh = clsoh_ref[0]                      # (K, M)
    gtc = gtc_ref[0]                           # (4, M)

    M = ann.shape[0]
    m_bits = max(1, (M - 1).bit_length())
    low_mask = (1 << m_bits) - 1

    ax1, ay1, ax2, ay2 = anc[0:1], anc[1:2], anc[2:3], anc[3:4]      # (1, TA)
    area_a = anc[4:5]
    acx, acy = anc[5:6], anc[6:7]
    inv_aw, inv_ah = anc[7:8], anc[8:9]
    a_valid = anc[9:10]                        # 1.0 real anchor / 0.0 padding

    gx1, gy1 = ann[:, 0:1], ann[:, 1:2]                              # (M, 1)
    gx2, gy2 = ann[:, 2:3], ann[:, 3:4]
    area_g = ann[:, 4:5]

    # ---------------- IoU (M, TA) ----------------
    iw = jnp.maximum(jnp.minimum(ax2, gx2) - jnp.maximum(ax1, gx1), 0.0)
    ih = jnp.maximum(jnp.minimum(ay2, gy2) - jnp.maximum(ay1, gy1), 0.0)
    inter = iw * ih
    ua = jnp.maximum(area_a + area_g - inter, 1e-8)
    r = pl.reciprocal(ua, approx=True)         # EUP slot
    r = r * (2.0 - ua * r)                     # one Newton step -> ~exact 1/ua
    iou = inter * r                            # >= 0; padded GT rows give exactly 0

    # ----- fused max + first-argmax over GT boxes (single sublane reduction) -----
    # iou >= 0 so its f32 bit pattern is order preserving as int32.  The lowest
    # m_bits mantissa bits are replaced by the reversed GT index, so one max
    # yields both the (negligibly truncated) max IoU and its first argmax.
    rev_idx = low_mask - lax.broadcasted_iota(jnp.int32, (M, 1), 0)   # (M, 1)
    key = (pltpu.bitcast(iou, jnp.int32) & (~low_mask)) | rev_idx     # (M, TA)
    key_max = jnp.max(key, axis=0, keepdims=True)                     # (1, TA)
    iou_max = pltpu.bitcast(key_max & (~low_mask), jnp.float32)       # (1, TA)
    onehot_m = (rev_idx == (key_max & low_mask)).astype(jnp.float32)  # (M, TA)

    positive = (iou_max >= 0.5) & (a_valid > 0.0)                     # (1, TA)
    pos_f = positive.astype(jnp.float32)
    num_pos = jnp.sum(pos_f)
    non_ignore_f = (positive | (iou_max < 0.4)).astype(jnp.float32) * a_valid

    # ------- MXU gathers: per-anchor class one-hot + assigned GT box -------
    one_hot = jnp.dot(cls_oh, onehot_m, preferred_element_type=jnp.float32)  # (K, TA)
    assigned = jnp.dot(gtc, onehot_m, preferred_element_type=jnp.float32)    # (4, TA)
    agx1, agy1 = assigned[0:1], assigned[1:2]
    agx2, agy2 = assigned[2:3], assigned[3:4]

    # ---------------- classification focal loss ----------------
    # background term for every (class, anchor) entry + a per-anchor positive
    # correction at the assigned class; exactly equal to the one-hot-target
    # formulation but without any (K, TA) selects / target tensors.
    p_c = jnp.clip(cls_p, 1e-4, 1.0 - 1e-4)                    # (K, TA)
    log1m = jnp.log(1.0 - p_c)                                 # EUP
    bg_elem = (p_c * p_c) * log1m                              # (K, TA), negative
    bg_row = jnp.sum(bg_elem, axis=0, keepdims=True)           # (1, TA)
    p_a = jnp.sum(one_hot * p_c, axis=0, keepdims=True)        # assigned-class prob
    p_a = jnp.clip(p_a, 1e-4, 1.0 - 1e-4)                      # guards log when no GT
    pos_term = ALPHA * (1.0 - p_a) * (1.0 - p_a) * (-jnp.log(p_a))
    bg_at_pa = (1.0 - ALPHA) * (p_a * p_a) * (-jnp.log(1.0 - p_a))
    cls_per_anchor = ((ALPHA - 1.0) * bg_row * non_ignore_f
                      + pos_f * (pos_term - bg_at_pa))
    cls_sum = jnp.sum(cls_per_anchor)

    # ---------------- regression smooth-L1 on positive anchors ----------------
    gw_raw = agx2 - agx1
    gh_raw = agy2 - agy1
    gcx = agx1 + 0.5 * gw_raw
    gcy = agy1 + 0.5 * gh_raw
    gw = jnp.maximum(gw_raw, 1.0)
    gh = jnp.maximum(gh_raw, 1.0)
    tdx = (gcx - acx) * inv_aw * 10.0          # / 0.1 folded into * 10
    tdy = (gcy - acy) * inv_ah * 10.0
    tdw = jnp.log(gw * inv_aw) * 5.0           # / 0.2 folded into * 5
    tdh = jnp.log(gh * inv_ah) * 5.0

    def smooth_l1(target_row, pred_row):       # (1, TA)
        d = jnp.abs(target_row - pred_row)
        return jnp.where(d <= 1.0 / 9.0, 4.5 * d * d, d - 1.0 / 18.0)

    reg_row = (smooth_l1(tdx, reg_p[0:1]) + smooth_l1(tdy, reg_p[1:2])
               + smooth_l1(tdw, reg_p[2:3]) + smooth_l1(tdh, reg_p[3:4]))
    reg_sum = jnp.sum(reg_row * pos_f)

    # ------- per-(image, tile) partial sums in an (8, 128)-aligned block -------
    sub = lax.broadcasted_iota(jnp.int32, (8, 128), 0)
    tile_out = jnp.where(sub == 0, cls_sum,
               jnp.where(sub == 1, reg_sum,
               jnp.where(sub == 2, num_pos, 0.0)))
    out_ref[...] = tile_out.reshape(1, 8, 128)


def focal_loss(classifications, regressions, anchors, annotations, tile_a=None):
    B, A, K = classifications.shape
    M = annotations.shape[1]
    f32 = jnp.float32

    # ---- generation-aware VMEM budget & anchor-tile selection ----
    try:
        vmem_phys = int(getattr(pltpu.get_tpu_info(), "vmem_capacity_bytes",
                                64 << 20))
    except Exception:                                       # unknown chip / interpret
        vmem_phys = 64 << 20
    # 48 MiB on v7x (64 MiB physical), 96 MiB on v5e/v6e (128 MiB physical)
    vmem_limit = int(min(vmem_phys * 3 // 4, 96 << 20))

    def _vmem_estimate(ta):        # double-buffered inputs + live (M,TA)/(K,TA) temps
        streamed = 2 * 4 * ta * (K + 4 + 10)
        per_image = 2 * 4 * M * (5 + K + 4) + 2 * 4 * 8 * 128
        interm = 4 * ta * (5 * M + 5 * K)
        return streamed + per_image + interm + (2 << 20)

    a_ceil = ((A + 127) // 128) * 128
    if tile_a is None:
        tile_a = 128
        for cand in (8192, 4096, 2048, 1024, 512, 256, 128):
            if cand <= a_ceil and _vmem_estimate(cand) <= vmem_limit:
                tile_a = cand
                break
    assert tile_a % 128 == 0, "anchor tile must be a multiple of 128"
    a_pad = ((A + tile_a - 1) // tile_a) * tile_a
    pad = a_pad - A
    num_tiles = a_pad // tile_a

    # lane-dense layouts: anchor axis last everywhere.
    # TODO(synk): produce the (B, K, A) layout upstream (classification head output)
    # to avoid this extra full-tensor HBM transpose; it is pure memory traffic.
    cls_t = jnp.transpose(classifications, (0, 2, 1)).astype(f32)     # (B, K, A)
    reg_t = jnp.transpose(regressions, (0, 2, 1)).astype(f32)         # (B, 4, A)
    if pad:
        cls_t = jnp.pad(cls_t, ((0, 0), (0, 0), (0, pad)), constant_values=0.5)
        reg_t = jnp.pad(reg_t, ((0, 0), (0, 0), (0, pad)))

    # batch-invariant anchor features precomputed once in the wrapper
    anchor = anchors[0].astype(f32)                                   # (A, 4)
    ax1, ay1, ax2, ay2 = (anchor[:, i] for i in range(4))
    aw = ax2 - ax1
    ah = ay2 - ay1
    anc_feat = jnp.stack(
        [ax1, ay1, ax2, ay2, aw * ah,
         ax1 + 0.5 * aw, ay1 + 0.5 * ah,
         1.0 / aw, 1.0 / ah, jnp.ones_like(aw)], axis=0)              # (10, A)
    if pad:
        pad_col = jnp.array([0., 0., 1., 1., 1., .5, .5, 1., 1., 0.], f32)[:, None]
        anc_feat = jnp.concatenate([anc_feat, jnp.tile(pad_col, (1, pad))], axis=1)

    # per-image GT views (padded rows have class == -1 -> all-zero one-hot column)
    annf = annotations.astype(f32)
    gx1, gy1, gx2, gy2, gcls = (annf[:, :, i] for i in range(5))      # (B, M)
    ann_iou = jnp.stack([gx1, gy1, gx2, gy2,
                         (gx2 - gx1) * (gy2 - gy1)], axis=-1)         # (B, M, 5)
    gtc = jnp.stack([gx1, gy1, gx2, gy2], axis=1)                     # (B, 4, M)
    cls_oh = (gcls[:, None, :] ==
              jnp.arange(K, dtype=f32)[None, :, None]).astype(f32)    # (B, K, M)
    num_valid = jnp.sum((gcls != -1.0).astype(f32), axis=1)           # (B,)

    out = pl.pallas_call(
        _focal_loss_kernel,
        out_shape=jax.ShapeDtypeStruct((B, num_tiles * 8, 128), f32),
        grid_spec=pltpu.PrefetchScalarGridSpec(
            num_scalar_prefetch=0,
            grid=(B, num_tiles),
            in_specs=[
                pl.BlockSpec((1, K, tile_a), lambda b, t: (b, 0, t)),
                pl.BlockSpec((1, 4, tile_a), lambda b, t: (b, 0, t)),
                pl.BlockSpec((10, tile_a), lambda b, t: (0, t)),
                pl.BlockSpec((1, M, 5), lambda b, t: (b, 0, 0)),
                pl.BlockSpec((1, K, M), lambda b, t: (b, 0, 0)),
                pl.BlockSpec((1, 4, M), lambda b, t: (b, 0, 0)),
            ],
            out_specs=pl.BlockSpec((1, 8, 128), lambda b, t: (b, t, 0)),
        ),
        compiler_params=pltpu.CompilerParams(
            dimension_semantics=("parallel", "parallel"),
            vmem_limit_bytes=vmem_limit),
    )(cls_t, reg_t, anc_feat, ann_iou, cls_oh, gtc)

    # glue: reduce per-tile partial sums, per-image normalization, batch mean.
    part = out.reshape(B, num_tiles, 8, 128)
    cls_sum = jnp.sum(part[:, :, 0, 0], axis=1)
    reg_sum = jnp.sum(part[:, :, 1, 0], axis=1)
    num_pos = jnp.sum(part[:, :, 2, 0], axis=1)
    has_ann = num_valid > 0.0

    cls_per = jnp.where(has_ann, cls_sum / jnp.maximum(num_pos, 1.0), 0.0)
    reg_per = jnp.where(has_ann & (num_pos > 0.0),
                        reg_sum / jnp.maximum(num_pos * 4.0, 1.0), 0.0)
    return jnp.mean(cls_per, keepdims=True), jnp.mean(reg_per, keepdims=True)


# ---------------- pure-JAX reference (mirrors the PyTorch module) ----------------
def _ref_single(cls_p, reg, anchor, ann):
    A, K = cls_p.shape
    M = ann.shape[0]
    ax1, ay1, ax2, ay2 = (anchor[:, i:i + 1] for i in range(4))
    gx1, gy1, gx2, gy2, gcls = (ann[:, i][None, :] for i in range(5))
    valid = gcls != -1.0
    num_valid = jnp.sum(valid)

    area_g = (gx2 - gx1) * (gy2 - gy1)
    area_a = (ax2 - ax1) * (ay2 - ay1)
    iw = jnp.maximum(jnp.minimum(ax2, gx2) - jnp.maximum(ax1, gx1), 0.0)
    ih = jnp.maximum(jnp.minimum(ay2, gy2) - jnp.maximum(ay1, gy1), 0.0)
    inter = iw * ih
    iou = inter / jnp.maximum(area_a + area_g - inter, 1e-8)
    iou = jnp.where(valid, iou, -1e9)
    iou_max = jnp.max(iou, axis=1, keepdims=True)
    m_idx = jnp.arange(M)[None, :]
    is_max = (iou == iou_max) & valid
    argmax = jnp.min(jnp.where(is_max, m_idx, M), axis=1, keepdims=True)
    onehot_m = (m_idx == argmax).astype(jnp.float32)
    gather = lambda r: jnp.sum(onehot_m * r, axis=1, keepdims=True)
    agx1, agy1, agx2, agy2, agcls = map(gather, (gx1, gy1, gx2, gy2, gcls))

    positive = iou_max >= 0.5
    num_pos = jnp.sum(positive.astype(jnp.float32))

    cls_c = jnp.clip(cls_p, 1e-4, 1.0 - 1e-4)
    one_hot_cls = (jnp.arange(K)[None, :] == agcls.astype(jnp.int32)).astype(jnp.float32)
    targets = jnp.where(positive, one_hot_cls, jnp.where(iou_max < 0.4, 0.0, -1.0))
    af = jnp.where(targets == 1.0, ALPHA, 1.0 - ALPHA)
    fw = jnp.where(targets == 1.0, 1.0 - cls_c, cls_c)
    fw = af * fw * fw
    bce = -(targets * jnp.log(cls_c) + (1.0 - targets) * jnp.log(1.0 - cls_c))
    cls_loss = jnp.where(targets != -1.0, fw * bce, 0.0)
    cls_val = jnp.sum(cls_loss) / jnp.maximum(num_pos, 1.0)

    aw, ah = ax2 - ax1, ay2 - ay1
    acx, acy = ax1 + 0.5 * aw, ay1 + 0.5 * ah
    gw_raw, gh_raw = agx2 - agx1, agy2 - agy1
    gcx, gcy = agx1 + 0.5 * gw_raw, agy1 + 0.5 * gh_raw
    gw, gh = jnp.maximum(gw_raw, 1.0), jnp.maximum(gh_raw, 1.0)
    t4 = jnp.concatenate([(gcx - acx) / aw / 0.1, (gcy - acy) / ah / 0.1,
                          jnp.log(gw / aw) / 0.2, jnp.log(gh / ah) / 0.2], axis=1)
    diff = jnp.abs(t4 - reg)
    reg_el = jnp.where(diff <= 1.0 / 9.0, 4.5 * diff * diff, diff - 1.0 / 18.0)
    reg_val = jnp.where(num_pos > 0,
                        jnp.sum(reg_el * positive) / jnp.maximum(num_pos * 4.0, 1.0), 0.0)
    has = num_valid > 0
    return jnp.where(has, cls_val, 0.0), jnp.where(has, reg_val, 0.0)


def focal_loss_ref(classifications, regressions, anchors, annotations):
    c, r = jax.vmap(_ref_single, in_axes=(0, 0, None, 0))(
        classifications, regressions, anchors[0], annotations)
    return jnp.mean(c, keepdims=True), jnp.mean(r, keepdims=True)


if __name__ == "__main__":
    key = jax.random.PRNGKey(0)
    k1, k2 = jax.random.split(key)

    B, A, K, M = 3, 256, 8, 8   # 16x16 anchor grid, 8 classes, up to 8 GT boxes

    # anchors: 16x16 grid of 32x32 boxes on a 512x512 image (stride 32)
    stride = 32.0
    cx = (jnp.arange(16, dtype=jnp.float32) + 0.5) * stride
    cy = (jnp.arange(16, dtype=jnp.float32) + 0.5) * stride
    cxg, cyg = jnp.meshgrid(cx, cy, indexing="ij")
    cxg, cyg = cxg.reshape(-1), cyg.reshape(-1)
    half = 16.0
    anchors = jnp.stack([cxg - half, cyg - half, cxg + half, cyg + half], axis=1)[None]

    classifications = jax.nn.sigmoid(jax.random.normal(k1, (B, A, K), jnp.float32))
    regressions = 0.1 * jax.random.normal(k2, (B, A, 4), jnp.float32)

    # annotations: a few GT boxes exactly matching anchor boxes (IoU 1.0), rest -1
    ann = -jnp.ones((B, M, 5), jnp.float32)

    def box_at(gi, gj, cls):
        x = (gi + 0.5) * stride
        y = (gj + 0.5) * stride
        return jnp.array([x - half, y - half, x + half, y + half, cls], jnp.float32)

    ann = ann.at[0, 0].set(box_at(2, 3, 1.0))
    ann = ann.at[0, 1].set(box_at(7, 7, 3.0))
    ann = ann.at[0, 2].set(box_at(12, 4, 5.0))
    ann = ann.at[1, 0].set(box_at(5, 10, 0.0))
    ann = ann.at[1, 1].set(box_at(9, 1, 7.0))
    # image 2 has no valid annotations -> must contribute 0 to both losses

    run = jax.jit(functools.partial(focal_loss, tile_a=128))   # 2 anchor tiles/image
    cls_loss, reg_loss = run(classifications, regressions, anchors, ann)
    jax.block_until_ready((cls_loss, reg_loss))

    cls_ref, reg_ref = focal_loss_ref(classifications, regressions, anchors, ann)
    assert cls_loss.shape == (1,) and reg_loss.shape == (1,)
    assert jnp.allclose(cls_loss, cls_ref, atol=1e-4, rtol=1e-4), (cls_loss, cls_ref)
    assert jnp.allclose(reg_loss, reg_ref, atol=1e-4, rtol=1e-4), (reg_loss, reg_ref)

    # non-128-multiple anchor count: exercises the auto-tile + anchor-padding path
    A2 = 250
    cls2, reg2 = jax.jit(focal_loss)(classifications[:, :A2], regressions[:, :A2],
                                     anchors[:, :A2], ann)
    jax.block_until_ready((cls2, reg2))
    cls2_ref, reg2_ref = focal_loss_ref(classifications[:, :A2], regressions[:, :A2],
                                        anchors[:, :A2], ann)
    assert jnp.allclose(cls2, cls2_ref, atol=1e-4, rtol=1e-4), (cls2, cls2_ref)
    assert jnp.allclose(reg2, reg2_ref, atol=1e-4, rtol=1e-4), (reg2, reg2_ref)

    print("KERNEL_OK")
</pallas_src>

<mosaic_0001>
module attributes {stable_mosaic.version = 11 : i64} {
  func.func @_focal_loss_kernel(%arg0: i32, %arg1: i32, %arg2: memref<1x8x128xf32, #tpu.memory_space<vmem>>, %arg3: memref<1x4x128xf32, #tpu.memory_space<vmem>>, %arg4: memref<10x128xf32, #tpu.memory_space<vmem>>, %arg5: memref<1x8x5xf32, #tpu.memory_space<vmem>>, %arg6: memref<1x8x8xf32, #tpu.memory_space<vmem>>, %arg7: memref<1x4x8xf32, #tpu.memory_space<vmem>>, %arg8: memref<1x8x128xf32, #tpu.memory_space<vmem>>) attributes {dimension_semantics = [#tpu.dimension_semantics<parallel>, #tpu.dimension_semantics<parallel>], iteration_bounds = array<i64: 3, 2>, scalar_prefetch = 0 : i64, scratch_operands = 0 : i64, tpu.core_type = #tpu.core_type<tc>, window_params = [{transform_indices = @transform_0, window_bounds = array<i64: 1, 8, 128>}, {transform_indices = @transform_1, window_bounds = array<i64: 1, 4, 128>}, {transform_indices = @transform_2, window_bounds = array<i64: 10, 128>}, {transform_indices = @transform_3, window_bounds = array<i64: 1, 8, 5>}, {transform_indices = @transform_4, window_bounds = array<i64: 1, 8, 8>}, {transform_indices = @transform_5, window_bounds = array<i64: 1, 4, 8>}, {transform_indices = @transform_6, window_bounds = array<i64: 1, 8, 128>}]} {
    %c0 = arith.constant 0 : index
    %c0_0 = arith.constant 0 : index
    %c0_1 = arith.constant 0 : index
    %0 = vector.load %arg2[%c0, %c0_0, %c0_1] : memref<1x8x128xf32, #tpu.memory_space<vmem>>, vector<1x8x128xf32>
    %1 = vector.shape_cast %0 : vector<1x8x128xf32> to vector<8x128xf32>
    %c0_2 = arith.constant 0 : index
    %c0_3 = arith.constant 0 : index
    %c0_4 = arith.constant 0 : index
    %2 = vector.load %arg3[%c0_2, %c0_3, %c0_4] : memref<1x4x128xf32, #tpu.memory_space<vmem>>, vector<1x4x128xf32>
    %3 = vector.shape_cast %2 : vector<1x4x128xf32> to vector<4x128xf32>
    %c0_5 = arith.constant 0 : index
    %c0_6 = arith.constant 0 : index
    %4 = vector.load %arg4[%c0_5, %c0_6] : memref<10x128xf32, #tpu.memory_space<vmem>>, vector<10x128xf32>
    %c0_7 = arith.constant 0 : index
    %c0_8 = arith.constant 0 : index
    %c0_9 = arith.constant 0 : index
    %5 = vector.load %arg5[%c0_7, %c0_8, %c0_9] : memref<1x8x5xf32, #tpu.memory_space<vmem>>, vector<1x8x5xf32>
    %6 = vector.shape_cast %5 : vector<1x8x5xf32> to vector<8x5xf32>
    %c0_10 = arith.constant 0 : index
    %c0_11 = arith.constant 0 : index
    %c0_12 = arith.constant 0 : index
    %7 = vector.load %arg6[%c0_10, %c0_11, %c0_12] : memref<1x8x8xf32, #tpu.memory_space<vmem>>, vector<1x8x8xf32>
    %8 = vector.shape_cast %7 : vector<1x8x8xf32> to vector<8x8xf32>
    %c0_13 = arith.constant 0 : index
    %c0_14 = arith.constant 0 : index
    %c0_15 = arith.constant 0 : index
    %9 = vector.load %arg7[%c0_13, %c0_14, %c0_15] : memref<1x4x8xf32, #tpu.memory_space<vmem>>, vector<1x4x8xf32>
    %10 = vector.shape_cast %9 : vector<1x4x8xf32> to vector<4x8xf32>
    %11 = vector.extract_strided_slice %4 {offsets = [0, 0], sizes = [1, 128], strides = [1, 1]} : vector<10x128xf32> to vector<1x128xf32>
    %12 = vector.extract_strided_slice %4 {offsets = [1, 0], sizes = [1, 128], strides = [1, 1]} : vector<10x128xf32> to vector<1x128xf32>
    %13 = vector.extract_strided_slice %4 {offsets = [2, 0], sizes = [1, 128], strides = [1, 1]} : vector<10x128xf32> to vector<1x128xf32>
    %14 = vector.extract_strided_slice %4 {offsets = [3, 0], sizes = [1, 128], strides = [1, 1]} : vector<10x128xf32> to vector<1x128xf32>
    %15 = vector.extract_strided_slice %4 {offsets = [4, 0], sizes = [1, 128], strides = [1, 1]} : vector<10x128xf32> to vector<1x128xf32>
    %16 = vector.extract_strided_slice %4 {offsets = [5, 0], sizes = [1, 128], strides = [1, 1]} : vector<10x128xf32> to vector<1x128xf32>
    %17 = vector.extract_strided_slice %4 {offsets = [6, 0], sizes = [1, 128], strides = [1, 1]} : vector<10x128xf32> to vector<1x128xf32>
    %18 = vector.extract_strided_slice %4 {offsets = [7, 0], sizes = [1, 128], strides = [1, 1]} : vector<10x128xf32> to vector<1x128xf32>
    %19 = vector.extract_strided_slice %4 {offsets = [8, 0], sizes = [1, 128], strides = [1, 1]} : vector<10x128xf32> to vector<1x128xf32>
    %20 = vector.extract_strided_slice %4 {offsets = [9, 0], sizes = [1, 128], strides = [1, 1]} : vector<10x128xf32> to vector<1x128xf32>
    %21 = vector.extract_strided_slice %6 {offsets = [0, 0], sizes = [8, 1], strides = [1, 1]} : vector<8x5xf32> to vector<8x1xf32>
    %22 = vector.extract_strided_slice %6 {offsets = [0, 1], sizes = [8, 1], strides = [1, 1]} : vector<8x5xf32> to vector<8x1xf32>
    %23 = vector.extract_strided_slice %6 {offsets = [0, 2], sizes = [8, 1], strides = [1, 1]} : vector<8x5xf32> to vector<8x1xf32>
    %24 = vector.extract_strided_slice %6 {offsets = [0, 3], sizes = [8, 1], strides = [1, 1]} : vector<8x5xf32> to vector<8x1xf32>
    %25 = vector.extract_strided_slice %6 {offsets = [0, 4], sizes = [8, 1], strides = [1, 1]} : vector<8x5xf32> to vector<8x1xf32>
    %26 = vector.broadcast %13 : vector<1x128xf32> to vector<8x128xf32>
    %27 = vector.broadcast %23 : vector<8x1xf32> to vector<8x128xf32>
    %28 = arith.minimumf %26, %27 : vector<8x128xf32>
    %29 = vector.broadcast %11 : vector<1x128xf32> to vector<8x128xf32>
    %30 = vector.broadcast %21 : vector<8x1xf32> to vector<8x128xf32>
    %31 = arith.maximumf %29, %30 : vector<8x128xf32>
    %32 = arith.subf %28, %31 : vector<8x128xf32>
    %cst = arith.constant 0.000000e+00 : f32
    %33 = vector.broadcast %cst : f32 to vector<8x128xf32>
    %34 = arith.maximumf %32, %33 : vector<8x128xf32>
    %35 = vector.broadcast %14 : vector<1x128xf32> to vector<8x128xf32>
    %36 = vector.broadcast %24 : vector<8x1xf32> to vector<8x128xf32>
    %37 = arith.minimumf %35, %36 : vector<8x128xf32>
    %38 = vector.broadcast %12 : vector<1x128xf32> to vector<8x128xf32>
    %39 = vector.broadcast %22 : vector<8x1xf32> to vector<8x128xf32>
    %40 = arith.maximumf %38, %39 : vector<8x128xf32>
    %41 = arith.subf %37, %40 : vector<8x128xf32>
    %cst_16 = arith.constant 0.000000e+00 : f32
    %42 = vector.broadcast %cst_16 : f32 to vector<8x128xf32>
    %43 = arith.maximumf %41, %42 : vector<8x128xf32>
    %44 = arith.mulf %34, %43 : vector<8x128xf32>
    %45 = vector.broadcast %15 : vector<1x128xf32> to vector<8x128xf32>
    %46 = vector.broadcast %25 : vector<8x1xf32> to vector<8x128xf32>
    %47 = arith.addf %45, %46 : vector<8x128xf32>
    %48 = arith.subf %47, %44 : vector<8x128xf32>
    %cst_17 = arith.constant 9.99999993E-9 : f32
    %49 = vector.broadcast %cst_17 : f32 to vector<8x128xf32>
    %50 = arith.maximumf %48, %49 : vector<8x128xf32>
    %51 = tpu.reciprocal %50 {approx = true} : vector<8x128xf32> -> vector<8x128xf32>
    %52 = arith.mulf %50, %51 : vector<8x128xf32>
    %cst_18 = arith.constant 2.000000e+00 : f32
    %53 = vector.broadcast %cst_18 : f32 to vector<8x128xf32>
    %54 = arith.subf %53, %52 : vector<8x128xf32>
    %55 = arith.mulf %51, %54 : vector<8x128xf32>
    %56 = arith.mulf %44, %55 : vector<8x128xf32>
    %57 = tpu.iota {dimensions = array<i32: 0>} : vector<8x1xi32>
    %c7_i32 = arith.constant 7 : i32
    %58 = vector.broadcast %c7_i32 : i32 to vector<8x1xi32>
    %59 = arith.subi %58, %57 : vector<8x1xi32>
    %60 = tpu.bitcast %56 : vector<8x128xf32> -> vector<8x128xi32>
    %c-8_i32 = arith.constant -8 : i32
    %61 = vector.broadcast %c-8_i32 : i32 to vector<8x128xi32>
    %62 = arith.andi %60, %61 : vector<8x128xi32>
    %63 = vector.broadcast %59 : vector<8x1xi32> to vector<8x128xi32>
    %64 = arith.ori %62, %63 : vector<8x128xi32>
    %cst_19 = arith.constant dense<-2147483648> : vector<128xi32>
    %65 = vector.multi_reduction <maxsi>, %64, %cst_19 [0] : vector<8x128xi32> to vector<128xi32>
    %66 = vector.shape_cast %65 : vector<128xi32> to vector<1x128xi32>
    %c-8_i32_20 = arith.constant -8 : i32
    %67 = vector.broadcast %c-8_i32_20 : i32 to vector<1x128xi32>
    %68 = arith.andi %66, %67 : vector<1x128xi32>
    %69 = tpu.bitcast %68 : vector<1x128xi32> -> vector<1x128xf32>
    %c7_i32_21 = arith.constant 7 : i32
    %70 = vector.broadcast %c7_i32_21 : i32 to vector<1x128xi32>
    %71 = arith.andi %66, %70 : vector<1x128xi32>
    %72 = vector.broadcast %59 : vector<8x1xi32> to vector<8x128xi32>
    %73 = vector.broadcast %71 : vector<1x128xi32> to vector<8x128xi32>
    %74 = arith.cmpi eq, %72, %73 : vector<8x128xi32>
    %75 = arith.extui %74 : vector<8x128xi1> to vector<8x128xi32>
    %76 = arith.sitofp %75 : vector<8x128xi32> to vector<8x128xf32>
    %cst_22 = arith.constant 5.000000e-01 : f32
    %77 = vector.broadcast %cst_22 : f32 to vector<1x128xf32>
    %78 = arith.cmpf oge, %69, %77 : vector<1x128xf32>
    %cst_23 = arith.constant 0.000000e+00 : f32
    %79 = vector.broadcast %cst_23 : f32 to vector<1x128xf32>
    %80 = arith.cmpf ogt, %20, %79 : vector<1x128xf32>
    %81 = arith.andi %78, %80 : vector<1x128xi1>
    %82 = arith.extui %81 : vector<1x128xi1> to vector<1x128xi32>
    %83 = arith.sitofp %82 : vector<1x128xi32> to vector<1x128xf32>
    %84 = vector.shape_cast %83 : vector<1x128xf32> to vector<1x1x128xf32>
    %cst_24 = arith.constant dense<0.000000e+00> : vector<1xf32>
    %85 = vector.multi_reduction <add>, %84, %cst_24 [1, 2] : vector<1x1x128xf32> to vector<1xf32>
    %86 = vector.shape_cast %85 : vector<1xf32> to vector<1x1x1xf32>
    %87 = vector.extract %86[0, 0, 0] : f32 from vector<1x1x1xf32>
    %cst_25 = arith.constant 4.000000e-01 : f32
    %88 = vector.broadcast %cst_25 : f32 to vector<1x128xf32>
    %89 = arith.cmpf olt, %69, %88 : vector<1x128xf32>
    %90 = arith.ori %81, %89 : vector<1x128xi1>
    %91 = arith.extui %90 : vector<1x128xi1> to vector<1x128xi32>
    %92 = arith.sitofp %91 : vector<1x128xi32> to vector<1x128xf32>
    %93 = arith.mulf %92, %20 : vector<1x128xf32>
    %cst_26 = arith.constant dense<0.000000e+00> : vector<8x128xf32>
    %94 = tpu.matmul %8, %76, %cst_26 {dimension_numbers = #tpu.dot_dimension_numbers<[1], [0], [0], [1], [0, 0, 1, 1], [], []>} : vector<8x8xf32>, vector<8x128xf32>, vector<8x128xf32> -> vector<8x128xf32>
    %cst_27 = arith.constant dense<0.000000e+00> : vector<4x128xf32>
    %95 = tpu.matmul %10, %76, %cst_27 {dimension_numbers = #tpu.dot_dimension_numbers<[1], [0], [0], [1], [0, 0, 1, 1], [], []>} : vector<4x8xf32>, vector<8x128xf32>, vector<4x128xf32> -> vector<4x128xf32>
    %96 = vector.extract_strided_slice %95 {offsets = [0, 0], sizes = [1, 128], strides = [1, 1]} : vector<4x128xf32> to vector<1x128xf32>
    %97 = vector.extract_strided_slice %95 {offsets = [1, 0], sizes = [1, 128], strides = [1, 1]} : vector<4x128xf32> to vector<1x128xf32>
    %98 = vector.extract_strided_slice %95 {offsets = [2, 0], sizes = [1, 128], strides = [1, 1]} : vector<4x128xf32> to vector<1x128xf32>
    %99 = vector.extract_strided_slice %95 {offsets = [3, 0], sizes = [1, 128], strides = [1, 1]} : vector<4x128xf32> to vector<1x128xf32>
    %cst_28 = arith.constant 9.99999974E-5 : f32
    %cst_29 = arith.constant 0.999899983 : f32
    %100 = vector.broadcast %cst_28 : f32 to vector<8x128xf32>
    %101 = arith.maximumf %100, %1 : vector<8x128xf32>
    %102 = vector.broadcast %cst_29 : f32 to vector<8x128xf32>
    %103 = arith.minimumf %102, %101 : vector<8x128xf32>
    %cst_30 = arith.constant 1.000000e+00 : f32
    %104 = vector.broadcast %cst_30 : f32 to vector<8x128xf32>
    %105 = arith.subf %104, %103 : vector<8x128xf32>
    %106 = math.log %105 : vector<8x128xf32>
    %107 = arith.mulf %103, %103 : vector<8x128xf32>
    %108 = arith.mulf %107, %106 : vector<8x128xf32>
    %cst_31 = arith.constant dense<0.000000e+00> : vector<128xf32>
    %109 = vector.multi_reduction <add>, %108, %cst_31 [0] : vector<8x128xf32> to vector<128xf32>
    %110 = vector.shape_cast %109 : vector<128xf32> to vector<1x128xf32>
    %111 = arith.mulf %94, %103 : vector<8x128xf32>
    %cst_32 = arith.constant dense<0.000000e+00> : vector<128xf32>
    %112 = vector.multi_reduction <add>, %111, %cst_32 [0] : vector<8x128xf32> to vector<128xf32>
    %113 = vector.shape_cast %112 : vector<128xf32> to vector<1x128xf32>
    %cst_33 = arith.constant 9.99999974E-5 : f32
    %cst_34 = arith.constant 0.999899983 : f32
    %114 = vector.broadcast %cst_33 : f32 to vector<1x128xf32>
    %115 = arith.maximumf %114, %113 : vector<1x128xf32>
    %116 = vector.broadcast %cst_34 : f32 to vector<1x128xf32>
    %117 = arith.minimumf %116, %115 : vector<1x128xf32>
    %cst_35 = arith.constant 1.000000e+00 : f32
    %118 = vector.broadcast %cst_35 : f32 to vector<1x128xf32>
    %119 = arith.subf %118, %117 : vector<1x128xf32>
    %cst_36 = arith.constant 2.500000e-01 : f32
    %120 = vector.broadcast %cst_36 : f32 to vector<1x128xf32>
    %121 = arith.mulf %120, %119 : vector<1x128xf32>
    %cst_37 = arith.constant 1.000000e+00 : f32
    %122 = vector.broadcast %cst_37 : f32 to vector<1x128xf32>
    %123 = arith.subf %122, %117 : vector<1x128xf32>
    %124 = arith.mulf %121, %123 : vector<1x128xf32>
    %125 = math.log %117 : vector<1x128xf32>
    %cst_38 = arith.constant 0.000000e+00 : f32
    %126 = vector.broadcast %cst_38 : f32 to vector<1x128xf32>
    %127 = arith.subf %126, %125 : vector<1x128xf32>
    %128 = arith.mulf %124, %127 : vector<1x128xf32>
    %129 = arith.mulf %117, %117 : vector<1x128xf32>
    %cst_39 = arith.constant 7.500000e-01 : f32
    %130 = vector.broadcast %cst_39 : f32 to vector<1x128xf32>
    %131 = arith.mulf %130, %129 : vector<1x128xf32>
    %cst_40 = arith.constant 1.000000e+00 : f32
    %132 = vector.broadcast %cst_40 : f32 to vector<1x128xf32>
    %133 = arith.subf %132, %117 : vector<1x128xf32>
    %134 = math.log %133 : vector<1x128xf32>
    %cst_41 = arith.constant 0.000000e+00 : f32
    %135 = vector.broadcast %cst_41 : f32 to vector<1x128xf32>
    %136 = arith.subf %135, %134 : vector<1x128xf32>
    %137 = arith.mulf %131, %136 : vector<1x128xf32>
    %cst_42 = arith.constant -7.500000e-01 : f32
    %138 = vector.broadcast %cst_42 : f32 to vector<1x128xf32>
    %139 = arith.mulf %138, %110 : vector<1x128xf32>
    %140 = arith.mulf %139, %93 : vector<1x128xf32>
    %141 = arith.subf %128, %137 : vector<1x128xf32>
    %142 = arith.mulf %83, %141 : vector<1x128xf32>
    %143 = arith.addf %140, %142 : vector<1x128xf32>
    %144 = vector.shape_cast %143 : vector<1x128xf32> to vector<1x1x128xf32>
    %cst_43 = arith.constant dense<0.000000e+00> : vector<1xf32>
    %145 = vector.multi_reduction <add>, %144, %cst_43 [1, 2] : vector<1x1x128xf32> to vector<1xf32>
    %146 = vector.shape_cast %145 : vector<1xf32> to vector<1x1x1xf32>
    %147 = vector.extract %146[0, 0, 0] : f32 from vector<1x1x1xf32>
    %148 = arith.subf %98, %96 : vector<1x128xf32>
    %149 = arith.subf %99, %97 : vector<1x128xf32>
    %cst_44 = arith.constant 5.000000e-01 : f32
    %150 = vector.broadcast %cst_44 : f32 to vector<1x128xf32>
    %151 = arith.mulf %150, %148 : vector<1x128xf32>
    %152 = arith.addf %96, %151 : vector<1x128xf32>
    %cst_45 = arith.constant 5.000000e-01 : f32
    %153 = vector.broadcast %cst_45 : f32 to vector<1x128xf32>
    %154 = arith.mulf %153, %149 : vector<1x128xf32>
    %155 = arith.addf %97, %154 : vector<1x128xf32>
    %cst_46 = arith.constant 1.000000e+00 : f32
    %156 = vector.broadcast %cst_46 : f32 to vector<1x128xf32>
    %157 = arith.maximumf %148, %156 : vector<1x128xf32>
    %cst_47 = arith.constant 1.000000e+00 : f32
    %158 = vector.broadcast %cst_47 : f32 to vector<1x128xf32>
    %159 = arith.maximumf %149, %158 : vector<1x128xf32>
    %160 = arith.subf %152, %16 : vector<1x128xf32>
    %161 = arith.mulf %160, %18 : vector<1x128xf32>
    %cst_48 = arith.constant 1.000000e+01 : f32
    %162 = vector.broadcast %cst_48 : f32 to vector<1x128xf32>
    %163 = arith.mulf %161, %162 : vector<1x128xf32>
    %164 = arith.subf %155, %17 : vector<1x128xf32>
    %165 = arith.mulf %164, %19 : vector<1x128xf32>
    %cst_49 = arith.constant 1.000000e+01 : f32
    %166 = vector.broadcast %cst_49 : f32 to vector<1x128xf32>
    %167 = arith.mulf %165, %166 : vector<1x128xf32>
    %168 = arith.mulf %157, %18 : vector<1x128xf32>
    %169 = math.log %168 : vector<1x128xf32>
    %cst_50 = arith.constant 5.000000e+00 : f32
    %170 = vector.broadcast %cst_50 : f32 to vector<1x128xf32>
    %171 = arith.mulf %169, %170 : vector<1x128xf32>
    %172 = arith.mulf %159, %19 : vector<1x128xf32>
    %173 = math.log %172 : vector<1x128xf32>
    %cst_51 = arith.constant 5.000000e+00 : f32
    %174 = vector.broadcast %cst_51 : f32 to vector<1x128xf32>
    %175 = arith.mulf %173, %174 : vector<1x128xf32>
    %176 = vector.extract_strided_slice %3 {offsets = [0, 0], sizes = [1, 128], strides = [1, 1]} : vector<4x128xf32> to vector<1x128xf32>
    %177 = arith.subf %163, %176 : vector<1x128xf32>
    %178 = math.absf %177 : vector<1x128xf32>
    %cst_52 = arith.constant 0.111111112 : f32
    %179 = vector.broadcast %cst_52 : f32 to vector<1x128xf32>
    %180 = arith.cmpf ole, %178, %179 : vector<1x128xf32>
    %cst_53 = arith.constant 4.500000e+00 : f32
    %181 = vector.broadcast %cst_53 : f32 to vector<1x128xf32>
    %182 = arith.mulf %181, %178 : vector<1x128xf32>
    %183 = arith.mulf %182, %178 : vector<1x128xf32>
    %cst_54 = arith.constant 0.055555556 : f32
    %184 = vector.broadcast %cst_54 : f32 to vector<1x128xf32>
    %185 = arith.subf %178, %184 : vector<1x128xf32>
    %186 = arith.select %180, %183, %185 : vector<1x128xi1>, vector<1x128xf32>
    %187 = vector.extract_strided_slice %3 {offsets = [1, 0], sizes = [1, 128], strides = [1, 1]} : vector<4x128xf32> to vector<1x128xf32>
    %188 = arith.subf %167, %187 : vector<1x128xf32>
    %189 = math.absf %188 : vector<1x128xf32>
    %cst_55 = arith.constant 0.111111112 : f32
    %190 = vector.broadcast %cst_55 : f32 to vector<1x128xf32>
    %191 = arith.cmpf ole, %189, %190 : vector<1x128xf32>
    %cst_56 = arith.constant 4.500000e+00 : f32
    %192 = vector.broadcast %cst_56 : f32 to vector<1x128xf32>
    %193 = arith.mulf %192, %189 : vector<1x128xf32>
    %194 = arith.mulf %193, %189 : vector<1x128xf32>
    %cst_57 = arith.constant 0.055555556 : f32
    %195 = vector.broadcast %cst_57 : f32 to vector<1x128xf32>
    %196 = arith.subf %189, %195 : vector<1x128xf32>
    %197 = arith.select %191, %194, %196 : vector<1x128xi1>, vector<1x128xf32>
    %198 = arith.addf %186, %197 : vector<1x128xf32>
    %199 = vector.extract_strided_slice %3 {offsets = [2, 0], sizes = [1, 128], strides = [1, 1]} : vector<4x128xf32> to vector<1x128xf32>
    %200 = arith.subf %171, %199 : vector<1x128xf32>
    %201 = math.absf %200 : vector<1x128xf32>
    %cst_58 = arith.constant 0.111111112 : f32
    %202 = vector.broadcast %cst_58 : f32 to vector<1x128xf32>
    %203 = arith.cmpf ole, %201, %202 : vector<1x128xf32>
    %cst_59 = arith.constant 4.500000e+00 : f32
    %204 = vector.broadcast %cst_59 : f32 to vector<1x128xf32>
    %205 = arith.mulf %204, %201 : vector<1x128xf32>
    %206 = arith.mulf %205, %201 : vector<1x128xf32>
    %cst_60 = arith.constant 0.055555556 : f32
    %207 = vector.broadcast %cst_60 : f32 to vector<1x128xf32>
    %208 = arith.subf %201, %207 : vector<1x128xf32>
    %209 = arith.select %203, %206, %208 : vector<1x128xi1>, vector<1x128xf32>
    %210 = arith.addf %198, %209 : vector<1x128xf32>
    %211 = vector.extract_strided_slice %3 {offsets = [3, 0], sizes = [1, 128], strides = [1, 1]} : vector<4x128xf32> to vector<1x128xf32>
    %212 = arith.subf %175, %211 : vector<1x128xf32>
    %213 = math.absf %212 : vector<1x128xf32>
    %cst_61 = arith.constant 0.111111112 : f32
    %214 = vector.broadcast %cst_61 : f32 to vector<1x128xf32>
    %215 = arith.cmpf ole, %213, %214 : vector<1x128xf32>
    %cst_62 = arith.constant 4.500000e+00 : f32
    %216 = vector.broadcast %cst_62 : f32 to vector<1x128xf32>
    %217 = arith.mulf %216, %213 : vector<1x128xf32>
    %218 = arith.mulf %217, %213 : vector<1x128xf32>
    %cst_63 = arith.constant 0.055555556 : f32
    %219 = vector.broadcast %cst_63 : f32 to vector<1x128xf32>
    %220 = arith.subf %213, %219 : vector<1x128xf32>
    %221 = arith.select %215, %218, %220 : vector<1x128xi1>, vector<1x128xf32>
    %222 = arith.addf %210, %221 : vector<1x128xf32>
    %223 = arith.mulf %222, %83 : vector<1x128xf32>
    %224 = vector.shape_cast %223 : vector<1x128xf32> to vector<1x1x128xf32>
    %cst_64 = arith.constant dense<0.000000e+00> : vector<1xf32>
    %225 = vector.multi_reduction <add>, %224, %cst_64 [1, 2] : vector<1x1x128xf32> to vector<1xf32>
    %226 = vector.shape_cast %225 : vector<1xf32> to vector<1x1x1xf32>
    %227 = vector.extract %226[0, 0, 0] : f32 from vector<1x1x1xf32>
    %228 = tpu.iota {dimensions = array<i32: 0>} : vector<8x128xi32>
    %c0_i32 = arith.constant 0 : i32
    %229 = vector.broadcast %c0_i32 : i32 to vector<8x128xi32>
    %230 = arith.cmpi eq, %228, %229 : vector<8x128xi32>
    %c1_i32 = arith.constant 1 : i32
    %231 = vector.broadcast %c1_i32 : i32 to vector<8x128xi32>
    %232 = arith.cmpi eq, %228, %231 : vector<8x128xi32>
    %c2_i32 = arith.constant 2 : i32
    %233 = vector.broadcast %c2_i32 : i32 to vector<8x128xi32>
    %234 = arith.cmpi eq, %228, %233 : vector<8x128xi32>
    %cst_65 = arith.constant 0.000000e+00 : f32
    %235 = vector.broadcast %87 : f32 to vector<8x128xf32>
    %236 = vector.broadcast %cst_65 : f32 to vector<8x128xf32>
    %237 = arith.select %234, %235, %236 : vector<8x128xi1>, vector<8x128xf32>
    %238 = vector.broadcast %227 : f32 to vector<8x128xf32>
    %239 = arith.select %232, %238, %237 : vector<8x128xi1>, vector<8x128xf32>
    %240 = vector.broadcast %147 : f32 to vector<8x128xf32>
    %241 = arith.select %230, %240, %239 : vector<8x128xi1>, vector<8x128xf32>
    %242 = vector.shape_cast %241 : vector<8x128xf32> to vector<1x8x128xf32>
    %c0_66 = arith.constant 0 : index
    %c0_67 = arith.constant 0 : index
    %c0_68 = arith.constant 0 : index
    %243 = vector.load %arg8[%c0_66, %c0_67, %c0_68] : memref<1x8x128xf32, #tpu.memory_space<vmem>>, vector<1x8x128xf32>
    tpu.vector_store %arg8[%c0_66, %c0_67, %c0_68], %242 {strides = array<i32>} : memref<1x8x128xf32, #tpu.memory_space<vmem>>, vector<1x8x128xf32>,
    return
  }
  func.func @transform_0(%arg0: i32, %arg1: i32) -> (i32, i32, i32) {
    %c0_i32 = arith.constant 0 : i32
    %c0_i32_0 = arith.constant 0 : i32
    return %arg0, %c0_i32, %arg1 : i32, i32, i32
  }
  func.func @transform_1(%arg0: i32, %arg1: i32) -> (i32, i32, i32) {
    %c0_i32 = arith.constant 0 : i32
    %c0_i32_0 = arith.constant 0 : i32
    return %arg0, %c0_i32, %arg1 : i32, i32, i32
  }
  func.func @transform_2(%arg0: i32, %arg1: i32) -> (i32, i32) {
    %c0_i32 = arith.constant 0 : i32
    %c0_i32_0 = arith.constant 0 : i32
    return %c0_i32, %arg1 : i32, i32
  }
  func.func @transform_3(%arg0: i32, %arg1: i32) -> (i32, i32, i32) {
    %c0_i32 = arith.constant 0 : i32
    %c0_i32_0 = arith.constant 0 : i32
    %c0_i32_1 = arith.constant 0 : i32
    return %arg0, %c0_i32, %c0_i32_0 : i32, i32, i32
  }
  func.func @transform_4(%arg0: i32, %arg1: i32) -> (i32, i32, i32) {
    %c0_i32 = arith.constant 0 : i32
    %c0_i32_0 = arith.constant 0 : i32
    %c0_i32_1 = arith.constant 0 : i32
    return %arg0, %c0_i32, %c0_i32_0 : i32, i32, i32
  }
  func.func @transform_5(%arg0: i32, %arg1: i32) -> (i32, i32, i32) {
    %c0_i32 = arith.constant 0 : i32
    %c0_i32_0 = arith.constant 0 : i32
    %c0_i32_1 = arith.constant 0 : i32
    return %arg0, %c0_i32, %c0_i32_0 : i32, i32, i32
  }
  func.func @transform_6(%arg0: i32, %arg1: i32) -> (i32, i32, i32) {
    %c0_i32 = arith.constant 0 : i32
    %c0_i32_0 = arith.constant 0 : i32
    return %arg0, %arg1, %c0_i32 : i32, i32, i32
  }
}

</mosaic_0001>

<bundles_post_ra>
// kernel: squeeze.36
= control target key start
LH: loop header
LB: loop body
LE: loop exit
PB: predicated region body
PF: predicated region fallthrough
CT: control target
= control target key end

     0   :  { %s46_s0 = inlined_call_operand.vmem [shape: f32[3,8,1], index: 0, kind: input, shape index: {}]   ;;  %s47_s1 = inlined_call_operand.vmem [shape: f32[3,1,8], index: 1, kind: output, shape index: {}]  }
   0x1   :  { %v4_v0 = vld [vmem:[%s46_s0] ss:$0 sm:$0xff]  ;;  %v14_v1 = vld [vmem:[%s46_s0 + $0x1] ss:$0 sm:$0xff]  ;;  %v16_v2 = vld [vmem:[%s46_s0 + $0x2] ss:$0 sm:$0xff] }
   0x2   :  { %5 = vst [vmem:[%s47_s1] sm:$0x1] %v4_v0  ;;  %15 = vst [vmem:[%s47_s1 + $0x1] sm:$0x1] %v14_v1 }
   0x3   :  { %17 = vst [vmem:[%s47_s1 + $0x2] sm:$0x1] %v16_v2 }

// kernel: focal_loss.1
= control target key start
LH: loop header
LB: loop body
LE: loop exit
PB: predicated region body
PF: predicated region fallthrough
CT: control target
= control target key end

     0   :  { %s1216_s21 = smov 0   ;;  %s1218_s22 = smov 0   ;;  %s1405_s0 = inlined_call_operand.vmem [shape: f32[3,8,256], index: 0, kind: input, shape index: {}]   ;;  %s1406_s1 = inlined_call_operand.vmem [shape: f32[3,4,256], index: 1, kind: input, shape index: {}]   ;;  %s1407_s2 = inlined_call_operand.vmem [shape: f32[10,256], index: 2, kind: input, shape index: {}]   ;;  %s1408_s3 = inlined_call_operand.vmem [shape: f32[3,8,5], index: 3, kind: input, shape index: {}]   ;;  %s1409_s4 = inlined_call_operand.vmem [shape: f32[3,8,8], index: 4, kind: input, shape index: {}]   ;;  %s1410_s5 = inlined_call_operand.vmem [shape: f32[3,4,8], index: 5, kind: input, shape index: {}]   ;;  %s1411_s6 = inlined_call_operand.vmem [shape: f32[3,16,128], index: 6, kind: output, shape index: {}]  }
   0x1   :  { %s1220_s23 = smov 0   ;;  %s1222_s24 = smov 0  }
   0x2   :  { %s1224_s25 = smov 0   ;;  %s1226_s26 = smov 0  }
   0x3   :  { %s1228_s27 = smov 0  }
   0x4 LB: > { %s25_s28 = sadd.s32 1, %s1163_s25  ;;  %s28_s29 = sadd.s32 1, %s1167_s26  ;;  %s1171_s27 = sphi %s1228_s27, %s16_s27   ;;  %s1167_s26 = sphi %s1226_s26, %s1421_s26   ;;  %s1163_s25 = sphi %s1224_s25, %s1420_s25   ;;  %s1159_s24 = sphi %s1222_s24, %s1419_s24   ;;  %s1155_s23 = sphi %s1220_s23, %s1418_s23   ;;  %s1151_s22 = sphi %s1218_s22, %s1417_s22   ;;  %s1147_s21 = sphi %s1216_s21, %s1416_s21  }
   0x5   : > { %p26_p0 = scmp.ge.s32.totalorder %s25_s28, 2  ;;  %s91_s30 = sadd.s32 1, %s1151_s22 }
   0x6   : > { %p98_p1 = scmp.ne.s32.totalorder %s1151_s22, %s1147_s21  ;;  %p99_p2 = scmp.eq.s32.totalorder %s1171_s27, 0 }
   0x7   : > { %s1423_s28 = smov (%p26_p0, %s25_s28), 0  ;;  %s1425_s29 = smov (!%p26_p0, %s28_s29), %s1167_s26 }
   0x8   : > { %s88_s7 = ssub.s32 %s1163_s25, %s1423_s28  ;;  %p100_p3 = por %p99_p2, %p98_p1 }
   0x9   : > { %p30_p4 = scmp.ge.s32.totalorder %s1425_s29, 3  ;;  %p89_p5 = scmp.eq.s32.totalorder %s88_s7, 0 }
   0xa   : > { %p988_p6 = scmp.ge.s32.totalorder %s1171_s27, 6 }
   0xb   : > { %s1427_s29 = smov (%p30_p4, %s1425_s29), 0 }
   0xc   : > { %s1265_s8 = scalar_select %p89_p5, %s1151_s22, %s91_s30  }
   0xd   : > { %230 = sbr.rel (%p988_p6) target bundleno = 27 (0x1b), region = 16 }
  0x14   : > { %255 = sbr.rel (!%p100_p3) target bundleno = 27 (0x1b), region = 28  ;;  %s257_s9 = sand.u32 (%p100_p3), 1, %s1151_s22  }
  0x15   : > { %s990_s10 = sshll.u32 (%p100_p3), %s1163_s25, 3  ;;  %s989_s11 = sshll.u32 (%p100_p3), %s257_s9, 4 }
  0x16   : > { %s261_s14 = scalar_lea.vmem (%p100_p3), %s1407_s2, %s990_s10  ;;  %s259_s15 = scalar_lea.vmem (%p100_p3), [#allocation2], %s989_s11 }
  0x17   : > { %v291_v0 = vld [vmem:[%s261_s14] sm:$0xff] (%p100_p3)  ;;  %v293_v1 = vld [vmem:[%s261_s14 + $0x10] sm:$0xff] (%p100_p3) }
  0x18   : > { %292 = vst [vmem:[%s259_s15] sm:$0xff] (%p100_p3), %v291_v0  ;;  %294 = vst [vmem:[%s259_s15 + $0x8] sm:$0xff] (%p100_p3), %v293_v1 }
  0x1b PF: > { %p991_p7 = scmp.ge.s32.totalorder %s1171_s27, 1  ;;  %p320_p8 = scmp.lt.s32.totalorder %s1171_s27, 7 }
  0x1d   : > { %p321_p9 = pnand %p991_p7, %p320_p8 }
  0x1e   : > { %p387_p10 = scmp.lt.s32.totalorder (!%p321_p9), %s1159_s24, 2  ;;  %v1173_v2 = vmov (!%p321_p9), 3   ;;  %v1174_v3 = vmov (!%p321_p9), 2   ;;  %v1175_v5 = vmov (!%p321_p9), 1   ;;  %v1176_v6 = vmov (!%p321_p9), 0   ;;  %s327_s20 = sand.u32 (!%p321_p9), 1, %s1147_s21  }
  0x1f   : > { %324 = sbr.rel (%p321_p9) target bundleno = 694 (0x2b6), region = 78  ;;  %1101 = vset.pattern.permute.xlu1 (!%p321_p9), %v1173_v2  ;;  %1099 = vset.pattern.permute.xlu0 (!%p321_p9), %v1174_v3  ;;  %v1177_v7 = vmov (!%p321_p9), 4   ;;  %v1178_v8 = vmov (!%p321_p9), 0.0   ;;  %vm1179_vm0 = vmmov (!%p321_p9), 0   ;;  %v430_v9 = vlaneseq (!%p321_p9)  ;;  %s1290_s30 = sshll.u32 (!%p321_p9), %s327_s20, 4 }
  0x20   : > { %1019 = vmatprep.subr.mxu0 (!%p321_p9), %v1178_v8  ;;  %1024 = vmatprep.subr.mxu1 (!%p321_p9), %v1178_v8  ;;  %s329_s7 = scalar_lea.vmem (!%p321_p9), [#allocation2], %s1290_s30  ;;  %vm533_vm5 = vcmask (!%p321_p9), 64512   ;;  %v1180_v59 = vmov (!%p321_p9), 1.0   ;;  %vm517_vm10 = vcmask (!%p321_p9), 1040384   ;;  %p389_p11 = scmp.lt.s32.totalorder (!%p321_p9), %s1155_s23, 1 }
  0x21   : > { %1021 = vmatprep.mubr.msk.f32.mxu0 (!%p321_p9), %vm1179_vm0, %v1178_v8  ;;  %1026 = vmatprep.mubr.msk.f32.mxu1 (!%p321_p9), %vm1179_vm0, %v1178_v8  ;;  %v1292_v10 = vshrl.u32 (!%p321_p9), %v430_v9, 7  ;;  %v1301_v15 = vld [vmem:[%s329_s7] sm:$0xff] (!%p321_p9)  ;;  %v1313_v52 = vld [vmem:[%s329_s7 + $0x8] sm:$0x3] (!%p321_p9) }
  0x22   : > { %vm510_vm4 = vcmp.gt.f32.partialorder (!%p321_p9), %v1313_v52, 0.0 }
  0x23   : > { %v453_v11 = vsub.s32 (!%p321_p9), 3, %v1292_v10  ;;  %v432_v12 = vsub.s32 (!%p321_p9), 2, %v1292_v10  ;;  %v462_v13 = vsub.s32 (!%p321_p9), 1, %v1292_v10  ;;  %v442_v14 = vsub.s32 (!%p321_p9), 0, %v1292_v10 }
  0x24   : > { %v474_v22 = vsub.s32 (!%p321_p9), 4, %v1292_v10  ;;  %v490_v44 = vsub.s32 (!%p321_p9), 7, %v1292_v10  ;;  %vm819_vm0 = vcmp.eq.s32.totalorder (!%p321_p9), %v1292_v10, 2 }
  0x25   : > { %v454_v18 = vrot.slane (!%p321_p9), %v1301_v15, %v453_v11  ;;  %v433_v19 = vrot.slane (!%p321_p9), %v1301_v15, %v432_v12  ;;  %v463_v20 = vrot.slane (!%p321_p9), %v1301_v15, %v462_v13  ;;  %v443_v21 = vrot.slane (!%p321_p9), %v1301_v15, %v442_v14 }
  0x26   : > { %s1429_s24 = smov (!%p387_p10, %s1159_s24), 2  ;;  %v475_v29 = vrot.slane %v1301_v15, %v474_v22  ;;  %s1431_s23 = smov (!%p389_p11, %s1155_s23), 1 }
  0x27   : > { %s997_s16 = sshll.u32 %s1429_s24, 3  ;;  %s999_s21 = sshll.u32 %s1429_s24, 2 }
  0x28   : > { %s406_s19 = scalar_lea.vmem %s1408_s3, %s997_s16  ;;  %s410_s11 = scalar_lea.vmem %s1409_s4, %s997_s16 }
  0x29   : > { %v427_v4 = vld [vmem:[%s406_s19] sm:$0xff]  ;;  %s414_s14 = scalar_lea.vmem %s1410_s5, %s999_s21  ;;  %s993_s15 = sshll.u32 %s1429_s24, 1 }
  0x2a   : > { %456 = vperm.xlu1 %1101, %v427_v4   ;;  %436 = vperm.xlu0 %1099, %v427_v4   ;;  %v428_v56 = vld [vmem:[%s410_s11] sm:$0xff]  ;;  %s1348_s16 = sadd.s32 %s993_s15, %s1431_s23 }
  0x2b   : > { %v429_v57 = vld [vmem:[%s414_s14] sm:$0xf]  ;;  %s994_s17 = sshll.u32 %s1348_s16, 3  ;;  %s996_s23 = sshll.u32 %s1348_s16, 2 }
  0x2c   : > { %s394_s20 = scalar_lea.vmem %s1405_s0, %s994_s17  ;;  %s402_s7 = scalar_lea.vmem %s1406_s1, %s996_s23 }
  0x2d   : > { %s422_s13 = scalar_lea.vmem %s1411_s6, %s994_s17 }
  0x2e   : > { %1102 = vset.pattern.permute.xlu1 %v1175_v5  ;;  %1100 = vset.pattern.permute.xlu0 %v1176_v6 }
  0x2f   : > { %465 = vperm.xlu1 %1102, %v427_v4   ;;  %445 = vperm.xlu0 %1100, %v427_v4  }
  0x33   : > { %1103 = vset.pattern.permute.xlu1 %v1177_v7  ;;  %1104 = vset.pattern.permute.xlu0 %v1177_v7  ;;  %v423_v7 = vld [vmem:[%s394_s20] sm:$0xff] }
  0x34   : > { %477 = vperm.xlu1 %1103, %v427_v4   ;;  %v680_v9 = vmax.f32 %v423_v7, 0.0001 }
  0x36   : > { %v681_v11 = vmin.f32 %v680_v9, 0.9999 }
  0x38   : > { %v682_v12 = vsub.f32 1.0, %v681_v11 }
  0xa9   : > { %v457_v16 = vpop.permute.xlu1 %456  ;;  %v437_v17 = vpop.permute.xlu0 %436 }
  0xaa   : > { %v459_v25 = vmin.f32 %v454_v18, %v457_v16  ;;  %v439_v26 = vmin.f32 %v433_v19, %v437_v17 }
  0xae   : > { %v466_v23 = vpop.permute.xlu1 %465  ;;  %v446_v24 = vpop.permute.xlu0 %445 }
  0xaf   : > { %v468_v27 = vmax.f32 %v463_v20, %v466_v23  ;;  %v448_v28 = vmax.f32 %v443_v21, %v446_v24  ;;  %v744_v23 = vrot.slane %v1301_v15, 5  ;;  %v760_v24 = vrot.slane %v1313_v52, 5 }
  0xb1   : > { %v469_v30 = vsub.f32 %v459_v25, %v468_v27  ;;  %v449_v31 = vsub.f32 %v439_v26, %v448_v28 }
  0xb3   : > { %v470_v32 = vmax.f32 %v469_v30, 0.0  ;;  %v450_v33 = vmax.f32 %v449_v31, 0.0  ;;  %v478_v34 = vpop.permute.xlu1 %477 }
  0xb4   : > { %v480_v35 = vadd.f32 %v478_v34, %v475_v29  ;;  %v685_v29 = vmul.f32 %v681_v11, %v681_v11  ;;  %v747_v34 = vrot.slane %v1301_v15, 7 }
  0xb5   : > { %v471_v36 = vmul.f32 %v470_v32, %v450_v33 }
  0xb7   : > { %v481_v37 = vsub.f32 %v480_v35, %v471_v36 }
  0xb9   : > { %v482_v38 = vmax.f32 %v481_v37, 1e-08  ;;  %v752_v37 = vrot.slane %v1313_v52, 7 }
  0xbb   : > { %1105 = vrcp.f32 %v482_v38 }
  0xbc   : > { %1107 = vlog2.f32 %v682_v12 }
  0xc5   : > { %v1106_v39 = vpop.eup %1105 }
  0xc6   : > { %v484_v40 = vmul.f32 %v1106_v39, %v482_v38  ;;  %v1108_v20 = vpop.eup %1107 }
  0xc7   : > { %v684_v28 = vmul.f32 0.6931472, %v1108_v20 }
  0xc8   : > { %v485_v41 = vsub.f32 2.0, %v484_v40 }
  0xc9   : > { %v686_v38 = vmul.f32 %v685_v29, %v684_v28 }
  0xca   : > { %v486_v42 = vmul.f32 %v1106_v39, %v485_v41 }
  0xcc   : > { %v487_v43 = vmul.f32 %v486_v42, %v471_v36 }
  0xce   : > { %v492_v45 = vand.u32 4294967288, %v487_v43 }
  0xd0   : > { %v493_v46 = vor.u32 %v492_v45, %v490_v44  ;;  %v687_v45 = vrot.slane %v686_v38, 4 }
  0xd2   : > { %v494_v47 = vrot.slane %v493_v46, 4 }
  0xd4   : > { %vm495_vm1 = vcmp.gt.s32.totalorder %v493_v46, %v494_v47 }
  0xd5   : > { %v496_v48 = vsel %vm495_vm1, %v493_v46, %v494_v47  ;;  %vm818_vm1 = vcmp.eq.s32.totalorder %v1292_v10, 1 }
  0xd6   : > { %v497_v49 = vrot.slane %v496_v48, 2 }
  0xd8   : > { %vm498_vm2 = vcmp.gt.s32.totalorder %v496_v48, %v497_v49 }
  0xd9   : > { %v499_v50 = vsel %vm498_vm2, %v496_v48, %v497_v49  ;;  %vm817_vm2 = vcmp.eq.s32.totalorder %v1292_v10, 0 }
  0xda   : > { %v500_v51 = vrot.slane %v499_v50, 1 }
  0xdc   : > { %vm501_vm3 = vcmp.gt.s32.totalorder %v499_v50, %v500_v51 }
  0xdd   : > { %v502_v53 = vsel %vm501_vm3, %v499_v50, %v500_v51  ;;  %v688_v51 = vadd.f32 %v687_v45, %v686_v38 }
  0xde   : > { %v503_v54 = vand.u32 4294967288, %v502_v53  ;;  %v505_v55 = vand.u32 7, %v502_v53 }
  0xe0   : > { %vm506_vm6 = vcmp.eq.s32.totalorder %v490_v44, %v505_v55  ;;  %vm509_vm7 = vcmp.ge.f32.partialorder %v503_v54, 0.5  ;;  %vm1324_vm8 = vcmp.lt.f32.partialorder %v503_v54, 0.4  ;;  %v424_v44 = vld [vmem:[%s402_s7] sm:$0xf] }
  0xe1   : > { %1020 = vmatpush3.msk.msra.mxu0 %vm506_vm6, %v1180_v59  ;;  %1025 = vmatpush3.msk.msra.mxu1 %vm506_vm6, %v1180_v59  ;;  %vm1328_vm9 = vmand %vm509_vm7, %vm510_vm4 }
  0xe2   : > { %1022 = vmatmul.mubr.msk.f32.vlgmr.msra.gmra.mrb[0].mxu0 %vm533_vm5, %v428_v56  ;;  %1027 = vmatmul.mubr.msk.f32.vlgmr.msra.gmra.mrb[0].mxu1 %vm533_vm5, %v429_v57  ;;  %v1335_v61 = vsel %vm1328_vm9, 1.0, %v1178_v8  ;;  %vm529_vm11 = vmor %vm1328_vm9, %vm1324_vm8 }
  0xe3   : > { %v515_v62 = vrot.slane %v1335_v61, 1 }
  0xe5   : > { %v518_v63 = vsel %vm517_vm10, %v515_v62, 0.0 }
  0xe6   : > { %519 = vadd.xlane.f32.xlu0 %v518_v63 }
 0x173   : > { %v520_v0 = vpop.xlane.xlu0 %519 }
 0x174   : > { %v521_v1 = vrot.slane %v520_v0, 4 }
 0x176   : > { %v522_v2 = vadd.f32 %v521_v1, %v520_v0 }
 0x178   : > { %v523_v3 = vrot.slane %v522_v2, 2 }
 0x17a   : > { %v524_v4 = vadd.f32 %v523_v3, %v522_v2  ;;  %v689_v3 = vrot.slane %v688_v51, 2 }
 0x17c   : > { %v525_v5 = vrot.slane %v524_v4, 1 }
 0x17e   : > { %v526_v6 = vadd.f32 %v525_v5, %v524_v4 }
 0x180   : > { %1029 = vpush %v526_v6 }
 0x1b1   : > { %s1030_s21 = spop %1029 }
 0x1b5   : > { %v603_v13 = vpop.f32.mrb[0].mxu0  ;;  %v676_v14 = vpop.f32.mrb[0].mxu1 }
 0x1b6   : > { %v693_v16 = vmul.f32 %v681_v11, %v603_v13  ;;  %v734_v17 = vrot.slane %v676_v14, 6  ;;  %v1023_v18 = vpop.f32.mrb[1].mxu0  ;;  %v1028_v19 = vpop.f32.mrb[1].mxu1 }
 0x1b8   : > { %v694_v21 = vrot.slane %v693_v16, 4  ;;  %v736_v22 = vsub.f32 %v676_v14, %v734_v17  ;;  %v690_v17 = vadd.f32 %v689_v3, %v688_v51 }
 0x1ba   : > { %v695_v25 = vadd.f32 %v694_v21, %v693_v16  ;;  %v737_v26 = vmul.f32 0.5, %v736_v22  ;;  %v742_v27 = vmax.f32 %v736_v22, 1.0 }
 0x1bc   : > { %v696_v30 = vrot.slane %v695_v25, 2  ;;  %v739_v31 = vrot.slane %v737_v26, 2  ;;  %v756_v32 = vmul.f32 %v744_v23, %v742_v27  ;;  %v762_v33 = vmul.f32 %v760_v24, %v742_v27 }
 0x1bd   : > { %v691_v27 = vrot.slane %v690_v17, 1 }
 0x1be   : > { %v697_v35 = vadd.f32 %v696_v30, %v695_v25  ;;  %v741_v36 = vadd.f32 %v739_v31, %v676_v14  ;;  %1109 = vlog2.f32 %v756_v32 }
 0x1bf   : > { %1111 = vlog2.f32 %v762_v33 }
 0x1c0   : > { %v698_v39 = vrot.slane %v697_v35, 1  ;;  %v746_v40 = vsub.f32 %v741_v36, %v744_v23  ;;  %v692_v36 = vadd.f32 %v691_v27, %v690_v17 }
 0x1c2   : > { %v699_v41 = vadd.f32 %v698_v39, %v697_v35  ;;  %v749_v42 = vmul.f32 %v747_v34, %v746_v40  ;;  %v754_v43 = vmul.f32 %v752_v37, %v746_v40 }
 0x1c4   : > { %v700_v46 = vmax.f32 %v699_v41, 0.0001  ;;  %v750_v15 = vmul.f32 10.0, %v749_v42  ;;  %v755_v47 = vmul.f32 10.0, %v754_v43  ;;  %v1004_v41 = vsel %vm529_vm11, 1.0, %v1178_v8 }
 0x1c6   : > { %v701_v48 = vmin.f32 %v700_v46, 0.9999  ;;  %v766_v49 = vsub.f32 %v750_v15, %v424_v44  ;;  %v773_v50 = vsub.f32 %v755_v47, %v424_v44  ;;  %v715_v46 = vmul.f32 -0.75, %v692_v36 }
 0x1c7   : > { %v532_v47 = vmul.f32 %v1004_v41, %v1313_v52 }
 0x1c8   : > { %v1110_v53 = vpop.eup %1109  ;;  %1113 = vlog2.f32 %v701_v48  ;;  %v767_v54 = vand.u32 2147483647, %v766_v49  ;;  %v774_v55 = vand.u32 2147483647, %v773_v50  ;;  %v702_v57 = vsub.f32 1.0, %v701_v48 }
 0x1c9   : > { %v1112_v56 = vpop.eup %1111  ;;  %v758_v59 = vmul.f32 0.6931472, %v1110_v53  ;;  %v709_v34 = vmul.f32 %v701_v48, %v701_v48  ;;  %v716_v60 = vmul.f32 %v715_v46, %v532_v47 }
 0x1ca   : > { %v764_v63 = vmul.f32 0.6931472, %v1112_v56  ;;  %v769_v0 = vmul.f32 4.5, %v767_v54  ;;  %v776_v1 = vmul.f32 4.5, %v774_v55  ;;  %v1010_v7 = vadd.f32 -0.055555556, %v774_v55 }
 0x1cb   : > { %v759_v2 = vmul.f32 5.0, %v758_v59  ;;  %vm775_vm12 = vcmp.le.f32.partialorder %v774_v55, 0.11111111  ;;  %1115 = vlog2.f32 %v702_v57  ;;  %v1009_v12 = vadd.f32 -0.055555556, %v767_v54 }
 0x1cc   : > { %v765_v4 = vmul.f32 5.0, %v764_v63  ;;  %v770_v5 = vmul.f32 %v769_v0, %v767_v54  ;;  %v777_v6 = vmul.f32 %v776_v1, %v774_v55  ;;  %vm768_vm13 = vcmp.le.f32.partialorder %v767_v54, 0.11111111 }
 0x1cd   : > { %v784_v9 = vsub.f32 %v759_v2, %v424_v44  ;;  %v703_v33 = vmul.f32 0.25, %v702_v57 }
 0x1ce   : > { %v795_v11 = vsub.f32 %v765_v4, %v424_v44  ;;  %v779_v13 = vsel %vm775_vm12, %v777_v6, %v1010_v7  ;;  %v772_v19 = vsel %vm768_vm13, %v770_v5, %v1009_v12  ;;  %v710_v44 = vmul.f32 0.75, %v709_v34 }
 0x1cf   : > { %v785_v14 = vand.u32 2147483647, %v784_v9  ;;  %v781_v16 = vrot.slane %v779_v13, 1  ;;  %v704_v43 = vmul.f32 %v703_v33, %v702_v57  ;;  %v820_v6 = vstv %s1030_s21 }
 0x1d0   : > { %v796_v18 = vand.u32 2147483647, %v795_v11  ;;  %v821_v9 = vsel %vm819_vm0, %v820_v6, 0.0 }
 0x1d1   : > { %v783_v20 = vadd.f32 %v781_v16, %v772_v19  ;;  %v787_v21 = vmul.f32 4.5, %v785_v14  ;;  %v1011_v22 = vadd.f32 -0.055555556, %v785_v14  ;;  %vm786_vm14 = vcmp.le.f32.partialorder %v785_v14, 0.11111111 }
 0x1d2   : > { %v1114_v23 = vpop.eup %1113  ;;  %v798_v24 = vmul.f32 4.5, %v796_v18  ;;  %v1012_v25 = vadd.f32 -0.055555556, %v796_v18  ;;  %vm797_vm15 = vcmp.le.f32.partialorder %v796_v18, 0.11111111 }
 0x1d3   : > { %v788_v26 = vmul.f32 %v787_v21, %v785_v14  ;;  %v706_v29 = vmul.f32 0.6931472, %v1114_v23 }
 0x1d4   : > { %v799_v28 = vmul.f32 %v798_v24, %v796_v18 }
 0x1d5   : > { %v790_v30 = vsel %vm786_vm14, %v788_v26, %v1011_v22  ;;  %v1116_v35 = vpop.eup %1115  ;;  %v707_v39 = vsub.f32 0.0, %v706_v29 }
 0x1d6   : > { %v792_v31 = vrot.slane %v790_v30, 2  ;;  %v801_v32 = vsel %vm797_vm15, %v799_v28, %v1012_v25  ;;  %v712_v40 = vmul.f32 0.6931472, %v1116_v35 }
 0x1d7   : > { %v803_v38 = vrot.slane %v801_v32, 3  ;;  %v708_v48 = vmul.f32 %v707_v39, %v704_v43 }
 0x1d8   : > { %v794_v37 = vadd.f32 %v792_v31, %v783_v20  ;;  %v713_v45 = vsub.f32 0.0, %v712_v40 }
 0x1da   : > { %v805_v42 = vadd.f32 %v803_v38, %v794_v37  ;;  %v714_v49 = vmul.f32 %v713_v45, %v710_v44 }
 0x1dc   : > { %v806_v15 = vmul.f32 %v805_v42, %v515_v62  ;;  %v717_v51 = vsub.f32 %v708_v48, %v714_v49 }
 0x1de   : > { %v807_v50 = vsel %vm517_vm10, %v806_v15, 0.0  ;;  %v718_v58 = vmul.f32 %v1335_v61, %v717_v51 }
 0x1df   : > { %808 = vadd.xlane.f32.xlu0 %v807_v50 }
 0x1e0   : > { %v719_v8 = vadd.f32 %v718_v58, %v716_v60 }
 0x1e2   : > { %v721_v53 = vrot.slane %v719_v8, 1 }
 0x1e4   : > { %v723_v54 = vsel %vm517_vm10, %v721_v53, 0.0 }
 0x1e5   : > { %724 = vadd.xlane.f32.xlu1 %v723_v54 }
 0x26c   : > { %v809_v55 = vpop.xlane.xlu0 %808 }
 0x26d   : > { %v810_v56 = vrot.slane %v809_v55, 4 }
 0x26f   : > { %v811_v57 = vadd.f32 %v810_v56, %v809_v55 }
 0x271   : > { %v812_v62 = vrot.slane %v811_v57, 2 }
 0x272   : > { %v725_v59 = vpop.xlane.xlu1 %724 }
 0x273   : > { %v726_v52 = vrot.slane %v725_v59, 4  ;;  %v813_v0 = vadd.f32 %v812_v62, %v811_v57 }
 0x275   : > { %v727_v63 = vadd.f32 %v726_v52, %v725_v59  ;;  %v814_v3 = vrot.slane %v813_v0, 1 }
 0x277   : > { %v728_v1 = vrot.slane %v727_v63, 2  ;;  %v815_v61 = vadd.f32 %v814_v3, %v813_v0 }
 0x279   : > { %v729_v2 = vadd.f32 %v728_v1, %v727_v63 }
 0x27b   : > { %v730_v4 = vrot.slane %v729_v2, 1 }
 0x27d   : > { %v731_v5 = vadd.f32 %v730_v4, %v729_v2 }
 0x27f   : > { %1031 = vpush %v731_v5 }
 0x280   : > { %1033 = vpush %v815_v61 }
 0x2b0   : > { %s1032_s9 = spop %1031 }
 0x2b1   : > { %v824_v7 = vstv %s1032_s9  ;;  %s1034_s10 = spop %1033 }
 0x2b2   : > { %v822_v11 = vstv %s1034_s10 }
 0x2b3   : > { %v823_v12 = vsel %vm818_vm1, %v822_v11, %v821_v9 }
 0x2b4   : > { %v825_v13 = vsel %vm817_vm2, %v824_v7, %v823_v12 }
 0x2b5   : > { %826 = vst [vmem:[%s422_s13] sm:$0xff] %v825_v13 }
 0x2b6 PF: > { %s16_s27 = sadd.s32 1, %s1171_s27   ;;  %s1416_s21 = smov %s1151_s22 }
 0x2b7   : > { %p13_p12 = scmp.ge.s32.totalorder %s16_s27, 8   ;;  %s1417_s22 = smov %s1265_s8 }
 0x2b8   : > { %s1418_s23 = smov %s1163_s25  ;;  %s1419_s24 = smov %s1167_s26 }
 0x2b9   : > { %s1420_s25 = smov %s1423_s28  ;;  %s1421_s26 = smov %s1427_s29 }
 0x2ba   :  { %15 = sbr.rel (!%p13_p12) target bundleno = 4 (0x4), region = 132 }

</bundles_post_ra>
